<compile_context>
chip_gen: v7x
topology: tpu7x:2x2x1
jax: 0.10.0
libtpu: 0.0.40
codegen_flags: <defaults>
</compile_context>

<pallas_src>
import functools

import jax
import jax.numpy as jnp
from jax import lax
from jax.experimental import pallas as pl
from jax.experimental.pallas import tpu as pltpu


def _round_up(x, m):
    return (x + m - 1) // m * m


def _cdiv(a, b):
    return (a + b - 1) // b


def _padded_block_bytes(shape2d, dtype):
    """VMEM footprint of a 2-D block including (sublane, lane) padding.

    A block whose last dim < 128 still occupies ceil(last/128)*128 lanes and its
    second-to-last dim pads to the dtype's sublane multiple (8 for f32, 16 for
    bf16), so the naive r*c*itemsize estimate under-counts by up to 128x.
    """
    r, c = shape2d
    itemsize = jnp.dtype(dtype).itemsize
    sublane = 32 // itemsize
    return (_round_up(max(int(r), 1), sublane)
            * _round_up(max(int(c), 1), 128) * itemsize)


@functools.lru_cache(maxsize=1)
def _vmem_capacity_bytes():
    """Physical VMEM per core (128 MiB v5e/v6e, 64 MiB v7x); safe fallback."""
    try:
        cap = getattr(pltpu.get_tpu_info(), "vmem_capacity_bytes", None)
        if cap:
            return int(cap)
    except Exception:
        pass
    return 64 * 1024 * 1024  # conservative: assume the smallest (v7x) VMEM


def _choose_batch_tile(batch, in_features, out_features, itemsize,
                       target_block_bytes):
    """Batch tile scaled by the padded row size, with a >=2-grid-step floor."""
    # Lane-dense output path (O == 1) writes (1, TB) blocks -> TB must be a
    # multiple of 128; the general path only needs the f32 sublane multiple.
    align = 128 if out_features == 1 else 8
    row_bytes = _round_up(in_features, 128) * itemsize   # padded VMEM bytes/row
    tb = (target_block_bytes // row_bytes) // align * align
    tb = max(align, min(tb, 4096))                       # bound activation spill
    b_aligned = _round_up(batch, align)
    tb = min(tb, b_aligned)
    # Keep >= 2 grid steps when the batch allows it so v7x's second TensorCore
    # gets a shard via dimension_semantics=("parallel",); the extra step costs
    # ~0.35 us on single-core v5e/v6e (noise).
    if b_aligned // tb < 2 and b_aligned >= 2 * align:
        tb = _round_up(_cdiv(b_aligned, 2), align)
    batch_padded = _cdiv(batch, tb) * tb
    return tb, batch_padded


def mlp_kernel_o1(x_ref, w1_ref, b1_ref, w2t_ref, b2_smem, o_ref):
    """Fused linear1 -> ReLU -> linear2 for a single output neuron (O == 1).

    The second layer is expressed as (1, H) x (TB, H)^T on the MXU so the
    result lands as a lane-dense (1, TB) row (batch on lanes). A (TB, 1)
    formulation would force masked single-lane stores and a 1-lane-wide
    writeback DMA.
    """
    h = jnp.dot(x_ref[...], w1_ref[...],
                preferred_element_type=jnp.float32)            # (TB, H)  MXU
    h = jnp.maximum(h + b1_ref[...], 0.0)                      # bias+ReLU, f32 VPU
    # Deliberate precision choice: feed the second matmul in the weight dtype
    # (no-op for f32, bf16 for the bf16 path); accumulate in f32.
    y_row = lax.dot_general(
        w2t_ref[...], h.astype(w2t_ref.dtype),
        dimension_numbers=(((1,), (1,)), ((), ())),
        preferred_element_type=jnp.float32)                    # (1, TB)  MXU
    o_ref[...] = (y_row + b2_smem[0]).astype(o_ref.dtype)      # b2: SMEM scalar


def mlp_kernel_general(x_ref, w1_ref, b1_ref, w2_ref, b2_ref, o_ref):
    """General O: both layers on the MXU, (TB, O) output block."""
    # NOTE: for 1 < O < 128 the output block stays lane-sparse; the showcased
    # O == 1 case uses the lane-dense kernel above instead.
    h = jnp.dot(x_ref[...], w1_ref[...],
                preferred_element_type=jnp.float32)
    h = jnp.maximum(h + b1_ref[...], 0.0)
    y = jnp.dot(h.astype(w2_ref.dtype), w2_ref[...],
                preferred_element_type=jnp.float32)
    o_ref[...] = (y + b2_ref[...]).astype(o_ref.dtype)


@functools.partial(jax.jit, static_argnames=("compute_dtype", "target_block_bytes"))
def linear_regression_forward(x, w1, b1, w2, b2, *, compute_dtype=jnp.float32,
                              target_block_bytes=2 * 1024 * 1024):
    """x: (B, F); w1: (F, H); b1: (H,); w2: (H, O); b2: (O,). Returns (B, O) f32.

    compute_dtype=jnp.bfloat16 halves HBM bytes for the dominant x stream and
    doubles the MXU rate; accumulation stays f32 (preferred_element_type) and
    bias + ReLU run in f32 on the VPU.
    """
    batch, in_features = x.shape
    hidden = w1.shape[1]
    out_features = w2.shape[1]
    out_dtype = jnp.float32

    cdtype = jnp.dtype(compute_dtype)
    itemsize = cdtype.itemsize
    xc = x.astype(cdtype)
    w1c = w1.astype(cdtype)
    b1f = b1.reshape(1, hidden).astype(jnp.float32)

    tb, batch_padded = _choose_batch_tile(batch, in_features, out_features,
                                          itemsize, target_block_bytes)
    if batch_padded != batch:
        # Only taken when tb does not divide B; padded rows produce garbage that
        # is sliced off below (costs one extra HBM copy of x on this path).
        xc = jnp.pad(xc, ((0, batch_padded - batch), (0, 0)))
    grid = (batch_padded // tb,)

    x_spec = pl.BlockSpec((tb, in_features), lambda i: (i, 0))
    # Constant index maps -> weights/biases stay VMEM-resident across the grid.
    # (For very large F*H on v7x's 64 MiB VMEM: single-buffer these via
    #  pipeline_mode=pl.Buffered(1) or add a K-tiling grid axis.)
    w1_spec = pl.BlockSpec((in_features, hidden), lambda i: (0, 0))
    b1_spec = pl.BlockSpec((1, hidden), lambda i: (0, 0))

    flops = (2 * batch_padded * in_features * hidden
             + 2 * batch_padded * hidden * out_features)
    vmem_cap = _vmem_capacity_bytes()

    if out_features == 1:
        w2t = w2.reshape(1, hidden).astype(cdtype)          # transposed for (1,H)x(TB,H)^T
        b2s = b2.reshape(1).astype(jnp.float32)             # 1-D SMEM scalar

        need = (2 * _padded_block_bytes((tb, in_features), cdtype)       # x (dbl buf)
                + 2 * _padded_block_bytes((1, tb), out_dtype)            # out (dbl buf)
                + 2 * (_padded_block_bytes((in_features, hidden), cdtype)
                       + _padded_block_bytes((1, hidden), jnp.float32)
                       + _padded_block_bytes((1, hidden), cdtype))       # resident weights
                + 2 * _padded_block_bytes((tb, hidden), jnp.float32))    # activation scratch
        vmem_limit = int(min(int(0.75 * vmem_cap),
                             max(16 * 1024 * 1024, 2 * need)))

        bytes_accessed = (batch_padded * in_features * itemsize
                          + in_features * hidden * itemsize
                          + hidden * 4 + hidden * itemsize + 4
                          + batch_padded * 4)
        cost = pl.CostEstimate(flops=flops, transcendentals=0,
                               bytes_accessed=bytes_accessed)

        out = pl.pallas_call(
            mlp_kernel_o1,
            out_shape=jax.ShapeDtypeStruct((1, batch_padded), out_dtype),
            grid=grid,
            in_specs=[
                x_spec,
                w1_spec,
                b1_spec,
                pl.BlockSpec((1, hidden), lambda i: (0, 0)),              # w2^T
                pl.BlockSpec(memory_space=pltpu.MemorySpace.SMEM),        # b2 scalar
            ],
            out_specs=pl.BlockSpec((1, tb), lambda i: (0, i)),            # lane-dense slab
            compiler_params=pltpu.CompilerParams(
                dimension_semantics=("parallel",),
                vmem_limit_bytes=vmem_limit),
            cost_estimate=cost,
        )(xc, w1c, b1f, w2t, b2s)
        return out.reshape(-1)[:batch].reshape(batch, 1).astype(out_dtype)

    # ---- general O > 1 path ----
    w2c = w2.astype(cdtype)
    b2f = b2.reshape(1, out_features).astype(jnp.float32)

    need = (2 * _padded_block_bytes((tb, in_features), cdtype)
            + 2 * _padded_block_bytes((tb, out_features), out_dtype)
            + 2 * (_padded_block_bytes((in_features, hidden), cdtype)
                   + _padded_block_bytes((1, hidden), jnp.float32)
                   + _padded_block_bytes((hidden, out_features), cdtype)
                   + _padded_block_bytes((1, out_features), jnp.float32))
            + 2 * _padded_block_bytes((tb, hidden), jnp.float32))
    vmem_limit = int(min(int(0.75 * vmem_cap),
                         max(16 * 1024 * 1024, 2 * need)))

    bytes_accessed = (batch_padded * in_features * itemsize
                      + in_features * hidden * itemsize
                      + hidden * 4
                      + hidden * out_features * itemsize + out_features * 4
                      + batch_padded * out_features * 4)
    cost = pl.CostEstimate(flops=flops, transcendentals=0,
                           bytes_accessed=bytes_accessed)

    out = pl.pallas_call(
        mlp_kernel_general,
        out_shape=jax.ShapeDtypeStruct((batch_padded, out_features), out_dtype),
        grid=grid,
        in_specs=[
            x_spec,
            w1_spec,
            b1_spec,
            pl.BlockSpec((hidden, out_features), lambda i: (0, 0)),
            pl.BlockSpec((1, out_features), lambda i: (0, 0)),
        ],
        out_specs=pl.BlockSpec((tb, out_features), lambda i: (i, 0)),
        compiler_params=pltpu.CompilerParams(
            dimension_semantics=("parallel",),
            vmem_limit_bytes=vmem_limit),
        cost_estimate=cost,
    )(xc, w1c, b1f, w2c, b2f)
    return out[:batch].astype(out_dtype)


def init_params(key, n_input_features, n_hidden_neurons, n_output_neurons):
    """PyTorch nn.Linear-style init U(-1/sqrt(fan_in), 1/sqrt(fan_in)); W stored (in, out)."""
    k1, k2, k3, k4 = jax.random.split(key, 4)
    bound1 = 1.0 / (n_input_features ** 0.5)
    bound2 = 1.0 / (n_hidden_neurons ** 0.5)
    w1 = jax.random.uniform(k1, (n_input_features, n_hidden_neurons),
                            jnp.float32, -bound1, bound1)
    b1 = jax.random.uniform(k2, (n_hidden_neurons,), jnp.float32, -bound1, bound1)
    w2 = jax.random.uniform(k3, (n_hidden_neurons, n_output_neurons),
                            jnp.float32, -bound2, bound2)
    b2 = jax.random.uniform(k4, (n_output_neurons,), jnp.float32, -bound2, bound2)
    return w1, b1, w2, b2


def _ref_forward(x, w1, b1, w2, b2):
    return jnp.maximum(x @ w1 + b1, 0.0) @ w2 + b2


if __name__ == "__main__":
    # Both the kernel and the pure-JAX reference use full-f32 matmul precision
    # so the tight tolerance below is meaningful.
    jax.config.update("jax_default_matmul_precision", "highest")

    key = jax.random.PRNGKey(0)
    k_small, k_big, k_gen = jax.random.split(key, 3)

    # --- primary small demo: F=8, H=32, O=1, batch=16 ---
    F, H, O, B = 8, 32, 1, 16
    kx, kp = jax.random.split(k_small)
    x = jax.random.normal(kx, (B, F), jnp.float32)
    w1, b1, w2, b2 = init_params(kp, F, H, O)
    out = jax.block_until_ready(linear_regression_forward(x, w1, b1, w2, b2))
    ref = _ref_forward(x, w1, b1, w2, b2)
    assert out.shape == (B, O)
    assert jnp.allclose(out, ref, atol=1e-5, rtol=1e-5)

    # --- larger batch: multi-step grid, lane-dense output slab ---
    B2, F2, H2 = 4096, 64, 128
    kx2, kp2 = jax.random.split(k_big)
    x2 = jax.random.normal(kx2, (B2, F2), jnp.float32)
    w1b, b1b, w2b, b2b = init_params(kp2, F2, H2, 1)
    ref2 = _ref_forward(x2, w1b, b1b, w2b, b2b)
    out2 = jax.block_until_ready(linear_regression_forward(x2, w1b, b1b, w2b, b2b))
    assert jnp.allclose(out2, ref2, atol=1e-4, rtol=1e-4)

    # bf16 input path (halved HBM traffic, 2x MXU rate); loose tolerance.
    out2_bf16 = jax.block_until_ready(
        linear_regression_forward(x2, w1b, b1b, w2b, b2b,
                                  compute_dtype=jnp.bfloat16))
    assert jnp.allclose(out2_bf16, ref2, atol=5e-2, rtol=5e-2)

    # --- general O > 1 path, non-tile-aligned batch (padding path) ---
    B3, F3, H3, O3 = 96, 8, 32, 4
    kx3, kp3 = jax.random.split(k_gen)
    x3 = jax.random.normal(kx3, (B3, F3), jnp.float32)
    w1g, b1g, w2g, b2g = init_params(kp3, F3, H3, O3)
    out3 = jax.block_until_ready(linear_regression_forward(x3, w1g, b1g, w2g, b2g))
    ref3 = _ref_forward(x3, w1g, b1g, w2g, b2g)
    assert out3.shape == (B3, O3)
    assert jnp.allclose(out3, ref3, atol=1e-5, rtol=1e-5)

    print("KERNEL_OK")
</pallas_src>

<mosaic_0001>
module attributes {stable_mosaic.version = 11 : i64} {
  func.func @mlp_kernel_o1(%arg0: i32, %arg1: memref<128x8xf32, #tpu.memory_space<vmem>>, %arg2: memref<8x32xf32, #tpu.memory_space<vmem>>, %arg3: memref<1x32xf32, #tpu.memory_space<vmem>>, %arg4: memref<1x32xf32, #tpu.memory_space<vmem>>, %arg5: memref<1xf32, #tpu.memory_space<smem>>, %arg6: memref<1x128xf32, #tpu.memory_space<vmem>>) attributes {dimension_semantics = [#tpu.dimension_semantics<parallel>], iteration_bounds = array<i64: 1>, scalar_prefetch = 0 : i64, scratch_operands = 0 : i64, tpu.core_type = #tpu.core_type<tc>, window_params = [{transform_indices = @transform_0, window_bounds = array<i64: 128, 8>}, {pipeline_mode = #tpu.pipeline_mode<synchronous>, transform_indices = @transform_1, window_bounds = array<i64: 8, 32>}, {pipeline_mode = #tpu.pipeline_mode<synchronous>, transform_indices = @transform_2, window_bounds = array<i64: 1, 32>}, {pipeline_mode = #tpu.pipeline_mode<synchronous>, transform_indices = @transform_3, window_bounds = array<i64: 1, 32>}, {transform_indices = @transform_4, window_bounds = array<i64: 1>}, {transform_indices = @transform_5, window_bounds = array<i64: 1, 128>}]} {
    %c0 = arith.constant 0 : index
    %c0_0 = arith.constant 0 : index
    %0 = vector.load %arg1[%c0, %c0_0] : memref<128x8xf32, #tpu.memory_space<vmem>>, vector<128x8xf32>
    %c0_1 = arith.constant 0 : index
    %c0_2 = arith.constant 0 : index
    %1 = vector.load %arg2[%c0_1, %c0_2] : memref<8x32xf32, #tpu.memory_space<vmem>>, vector<8x32xf32>
    %cst = arith.constant dense<0.000000e+00> : vector<128x32xf32>
    %2 = tpu.matmul %0, %1, %cst {dimension_numbers = #tpu.dot_dimension_numbers<[1], [0], [0], [1], [0, 0, 1, 1], [], []>, precision = #tpu.contract_precision<fp32>} : vector<128x8xf32>, vector<8x32xf32>, vector<128x32xf32> -> vector<128x32xf32>
    %c0_3 = arith.constant 0 : index
    %c0_4 = arith.constant 0 : index
    %3 = vector.load %arg3[%c0_3, %c0_4] : memref<1x32xf32, #tpu.memory_space<vmem>>, vector<1x32xf32>
    %4 = vector.broadcast %3 : vector<1x32xf32> to vector<128x32xf32>
    %5 = arith.addf %2, %4 : vector<128x32xf32>
    %cst_5 = arith.constant 0.000000e+00 : f32
    %6 = vector.broadcast %cst_5 : f32 to vector<128x32xf32>
    %7 = arith.maximumf %5, %6 : vector<128x32xf32>
    %c0_6 = arith.constant 0 : index
    %c0_7 = arith.constant 0 : index
    %8 = vector.load %arg4[%c0_6, %c0_7] : memref<1x32xf32, #tpu.memory_space<vmem>>, vector<1x32xf32>
    %cst_8 = arith.constant dense<0.000000e+00> : vector<1x128xf32>
    %9 = tpu.matmul %8, %7, %cst_8 {dimension_numbers = #tpu.dot_dimension_numbers<[1], [1], [0], [0], [0, 0, 1, 0], [], []>, precision = #tpu.contract_precision<fp32>} : vector<1x32xf32>, vector<128x32xf32>, vector<1x128xf32> -> vector<1x128xf32>
    %c0_9 = arith.constant 0 : index
    %10 = memref.load %arg5[%c0_9] : memref<1xf32, #tpu.memory_space<smem>>
    %11 = vector.broadcast %10 : f32 to vector<1x128xf32>
    %12 = arith.addf %9, %11 : vector<1x128xf32>
    %c0_10 = arith.constant 0 : index
    %c0_11 = arith.constant 0 : index
    %13 = vector.load %arg6[%c0_10, %c0_11] : memref<1x128xf32, #tpu.memory_space<vmem>>, vector<1x128xf32>
    tpu.vector_store %arg6[%c0_10, %c0_11], %12 {strides = array<i32>} : memref<1x128xf32, #tpu.memory_space<vmem>>, vector<1x128xf32>,
    return
  }
  func.func @transform_0(%arg0: i32) -> (i32, i32) {
    %c0_i32 = arith.constant 0 : i32
    %c0_i32_0 = arith.constant 0 : i32
    return %arg0, %c0_i32 : i32, i32
  }
  func.func @transform_1(%arg0: i32) -> (i32, i32) {
    %c0_i32 = arith.constant 0 : i32
    %c0_i32_0 = arith.constant 0 : i32
    %c0_i32_1 = arith.constant 0 : i32
    return %c0_i32, %c0_i32_0 : i32, i32
  }
  func.func @transform_2(%arg0: i32) -> (i32, i32) {
    %c0_i32 = arith.constant 0 : i32
    %c0_i32_0 = arith.constant 0 : i32
    %c0_i32_1 = arith.constant 0 : i32
    return %c0_i32, %c0_i32_0 : i32, i32
  }
  func.func @transform_3(%arg0: i32) -> (i32, i32) {
    %c0_i32 = arith.constant 0 : i32
    %c0_i32_0 = arith.constant 0 : i32
    %c0_i32_1 = arith.constant 0 : i32
    return %c0_i32, %c0_i32_0 : i32, i32
  }
  func.func @transform_4(%arg0: i32) -> i32 {
    %c0_i32 = arith.constant 0 : i32
    %c0_i32_0 = arith.constant 0 : i32
    return %c0_i32 : i32
  }
  func.func @transform_5(%arg0: i32) -> (i32, i32) {
    %c0_i32 = arith.constant 0 : i32
    %c0_i32_0 = arith.constant 0 : i32
    return %c0_i32, %arg0 : i32, i32
  }
}

</mosaic_0001>

<bundles_post_ra>
// kernel: linear_regression_forward.1
= control target key start
LH: loop header
LB: loop body
LE: loop exit
PB: predicated region body
PF: predicated region fallthrough
CT: control target
= control target key end

     0   :  { %vm45_vm0 = vcmask 64512   ;;  %vm2727_vm1 = vmmov 0   ;;  %vm1204_vm2 = vcmask 261120   ;;  %s3396_s1 = inlined_call_operand.vmem [shape: f32[8,32], index: 1, kind: input, shape index: {}]   ;;  %s3397_s0 = inlined_call_operand.vmem [shape: f32[128,8], index: 0, kind: input, shape index: {}]   ;;  %s3398_s2 = inlined_call_operand.vmem [shape: f32[1,32], index: 2, kind: input, shape index: {}]   ;;  %s3399_s3 = inlined_call_operand.vmem [shape: f32[1,32], index: 3, kind: input, shape index: {}]   ;;  %s3400_s4 = inlined_call_operand.<no memory space> [shape: f32[1], index: 4, kind: input, shape index: {}]   ;;  %s3401_s5 = inlined_call_operand.vmem [shape: f32[1,128], index: 5, kind: output, shape index: {}]  }
   0x1   :  { %v37_v0 = vld [vmem:[%s3396_s1] sm:$0xff]  ;;  %v22_v6 = vld [vmem:[%s3397_s0 + $0x8] sm:$0xff]  ;;  %v23_v7 = vld [vmem:[%s3397_s0 + $0x10] sm:$0xff] }
   0x2   :  { %v21_v1 = vld [vmem:[%s3397_s0] sm:$0xff]  ;;  %v2765_v2 = vand.u32 4294901760, %v37_v0  ;;  %v50_v9 = vsel %vm45_vm0, %v22_v6, 0  ;;  %v53_v11 = vsel %vm45_vm0, %v23_v7, 0  ;;  %v24_v12 = vld [vmem:[%s3397_s0 + $0x18] sm:$0xff]  ;;  %v26_v19 = vld [vmem:[%s3397_s0 + $0x28] sm:$0xff] }
   0x3   :  { %v47_v3 = vsel %vm45_vm0, %v21_v1, 0  ;;  %v25_v13 = vld [vmem:[%s3397_s0 + $0x20] sm:$0xff]  ;;  %v2791_v15 = vand.u32 4294901760, %v50_v9  ;;  %v2793_v16 = vand.u32 4294901760, %v53_v11  ;;  %v56_v17 = vsel %vm45_vm0, %v24_v12, 0  ;;  %v27_v20 = vld [vmem:[%s3397_s0 + $0x30] sm:$0xff] }
   0x4   :  { %v2768_v4 = vand.u32 4294901760, %v47_v3  ;;  %v322_v5 = vsub.f32 %v37_v0, %v2765_v2  ;;  %2107 = vmatprep.subr.mxu1 %v2765_v2  ;;  %v59_v18 = vsel %vm45_vm0, %v25_v13, 0  ;;  %v2807_v22 = vand.u32 4294901760, %v56_v17  ;;  %v28_v27 = vld [vmem:[%s3397_s0 + $0x38] sm:$0xff]  ;;  %v29_v30 = vld [vmem:[%s3397_s0 + $0x40] sm:$0xff]  ;;  %v30_v43 = vld [vmem:[%s3397_s0 + $0x48] sm:$0xff] }
   0x5   :  { %2108 = vmatpush3.msra.mxu1 %v2765_v2  ;;  %v2804_v21 = vsub.f32 %v50_v9, %v2791_v15  ;;  %v2810_v23 = vand.u32 4294901760, %v59_v18  ;;  %v62_v24 = vsel %vm45_vm0, %v26_v19, 0  ;;  %v65_v25 = vsel %vm45_vm0, %v27_v20, 0  ;;  %v31_v47 = vld [vmem:[%s3397_s0 + $0x50] sm:$0xff]  ;;  %v32_v59 = vld [vmem:[%s3397_s0 + $0x58] sm:$0xff]  ;;  %v33_v63 = vld [vmem:[%s3397_s0 + $0x60] sm:$0xff] }
   0x6   :  { %2135 = vmatprep.mubr.f32.mxu0 %v2768_v4  ;;  %v2780_v8 = vand.u32 4294901760, %v322_v5  ;;  %v2815_v26 = vsub.f32 %v47_v3, %v2768_v4  ;;  %v2822_v28 = vsub.f32 %v53_v11, %v2793_v16  ;;  %v2825_v29 = vsub.f32 %v56_v17, %v2807_v22  ;;  %v34_v12 = vld [vmem:[%s3397_s0 + $0x68] sm:$0xff] }
   0x7   :  { %v2831_v31 = vsub.f32 %v59_v18, %v2810_v23  ;;  %v172_v33 = vand.u32 4294901760, %v2804_v21  ;;  %v2836_v34 = vand.u32 4294901760, %v62_v24  ;;  %v2838_v35 = vand.u32 4294901760, %v65_v25  ;;  %v35_v18 = vld [vmem:[%s3397_s0 + $0x70] sm:$0xff] }
   0x8   :  { %v324_v10 = vsub.f32 %v322_v5, %v2780_v8  ;;  %v162_v32 = vand.u32 4294901760, %v2815_v26  ;;  %v182_v36 = vand.u32 4294901760, %v2822_v28  ;;  %v192_v37 = vand.u32 4294901760, %v2825_v29 }
   0x9   :  { %v68_v38 = vsel %vm45_vm0, %v28_v27, 0  ;;  %v202_v39 = vand.u32 4294901760, %v2831_v31  ;;  %v173_v41 = vsub.f32 %v2804_v21, %v172_v33  ;;  %v71_v42 = vsel %vm45_vm0, %v29_v30, 0 }
   0xa   :  { %v325_v14 = vand.u32 4294901760, %v324_v10  ;;  %v163_v40 = vsub.f32 %v2815_v26, %v162_v32  ;;  %v2856_v44 = vsub.f32 %v62_v24, %v2836_v34  ;;  %v183_v45 = vsub.f32 %v2822_v28, %v182_v36 }
   0xb   :  { %v193_v46 = vsub.f32 %v2825_v29, %v192_v37  ;;  %v2868_v48 = vsub.f32 %v65_v25, %v2838_v35  ;;  %v174_v50 = vand.u32 4294901760, %v173_v41  ;;  %v203_v51 = vsub.f32 %v2831_v31, %v202_v39 }
   0xc   :  { %2133 = vmatprep.subr.mxu0 %v325_v14  ;;  %v164_v49 = vand.u32 4294901760, %v163_v40  ;;  %v2874_v52 = vand.u32 4294901760, %v68_v38  ;;  %v212_v53 = vand.u32 4294901760, %v2856_v44  ;;  %v184_v54 = vand.u32 4294901760, %v183_v45 }
   0xd   :  { %2134 = vmatpush3.msra.mxu0 %v325_v14  ;;  %v2878_v55 = vand.u32 4294901760, %v71_v42  ;;  %v74_v56 = vsel %vm45_vm0, %v30_v43, 0  ;;  %v222_v57 = vand.u32 4294901760, %v2868_v48  ;;  %v77_v58 = vsel %vm45_vm0, %v31_v47, 0 }
   0xe   :  { %2136 = vmatmul.mubr.f32.vlgmr.msra.gmra.mrb[0].mxu0 %v2791_v15  ;;  %2159 = vmatprep.subr.mxu0 %v322_v5  ;;  %v2887_v60 = vsub.f32 %v68_v38, %v2874_v52  ;;  %v194_v61 = vand.u32 4294901760, %v193_v46  ;;  %v213_v62 = vsub.f32 %v2856_v44, %v212_v53  ;;  %v204_v1 = vand.u32 4294901760, %v203_v51 }
   0xf   :  { %2160 = vmatpush3.msra.mxu0 %v322_v5  ;;  %2138 = vmatprep.mubr.f32.mxu0 %v2793_v16  ;;  %v2896_v0 = vsub.f32 %v71_v42, %v2878_v55  ;;  %v223_v3 = vsub.f32 %v2868_v48, %v222_v57  ;;  %v2902_v5 = vand.u32 4294901760, %v74_v56  ;;  %v2906_v7 = vand.u32 4294901760, %v77_v58  ;;  %v36_v42 = vld [vmem:[%s3397_s0 + $0x78] sm:$0xff] }
  0x10   :  { %2185 = vmatprep.subr.mxu0 %v2765_v2  ;;  %2109 = vmatprep.mubr.f32.mxu1 %v164_v49  ;;  %v232_v6 = vand.u32 4294901760, %v2887_v60  ;;  %v80_v9 = vsel %vm45_vm0, %v32_v59, 0  ;;  %v83_v11 = vsel %vm45_vm0, %v33_v63, 0  ;;  %v214_v14 = vand.u32 4294901760, %v213_v62 }
  0x11   :  { %2110 = vmatmul.mubr.f32.vlgmr.msra.gmra.mrb[0].mxu1 %v174_v50  ;;  %v242_v10 = vand.u32 4294901760, %v2896_v0  ;;  %v2915_v13 = vsub.f32 %v74_v56, %v2902_v5  ;;  %v2924_v19 = vsub.f32 %v77_v58, %v2906_v7  ;;  %v224_v20 = vand.u32 4294901760, %v223_v3 }
  0x12   :  { %2139 = vmatmul.mubr.f32.gmra.mrb[2].mxu0 %v2807_v22  ;;  %2112 = vmatprep.mubr.f32.mxu1 %v184_v54  ;;  %v233_v17 = vsub.f32 %v2887_v60, %v232_v6  ;;  %v2930_v25 = vand.u32 4294901760, %v80_v9  ;;  %v2934_v30 = vand.u32 4294901760, %v83_v11  ;;  %v86_v38 = vsel %vm45_vm0, %v34_v12, 0 }
  0x13   :  { %2141 = vmatprep.mubr.f32.mxu0 %v2810_v23  ;;  %v243_v24 = vsub.f32 %v2896_v0, %v242_v10  ;;  %v252_v27 = vand.u32 4294901760, %v2915_v13  ;;  %v262_v40 = vand.u32 4294901760, %v2924_v19  ;;  %v89_v41 = vsel %vm45_vm0, %v35_v18, 0 }
  0x14   :  { %v2943_v43 = vsub.f32 %v80_v9, %v2930_v25  ;;  %v234_v45 = vand.u32 4294901760, %v233_v17  ;;  %v2949_v47 = vsub.f32 %v83_v11, %v2934_v30  ;;  %v2955_v51 = vand.u32 4294901760, %v86_v38 }
  0x15   :  { %2113 = vmatmul.mubr.f32.gmra.mrb[2].mxu1 %v194_v61  ;;  %v253_v46 = vsub.f32 %v2915_v13, %v252_v27  ;;  %v244_v49 = vand.u32 4294901760, %v243_v24  ;;  %v263_v50 = vsub.f32 %v2924_v19, %v262_v40  ;;  %v2959_v56 = vand.u32 4294901760, %v89_v41 }
  0x16   :  { %2142 = vmatmul.mubr.f32.gmra.mrb[4].mxu0 %v2836_v34  ;;  %2115 = vmatprep.mubr.f32.mxu1 %v204_v1  ;;  %v272_v54 = vand.u32 4294901760, %v2943_v43  ;;  %v92_v58 = vsel %vm45_vm0, %v36_v42, 0  ;;  %v282_v59 = vand.u32 4294901760, %v2949_v47  ;;  %v2964_v61 = vsub.f32 %v86_v38, %v2955_v51 }
  0x17   :  { %2144 = vmatprep.mubr.f32.mxu0 %v2838_v35  ;;  %v254_v62 = vand.u32 4294901760, %v253_v46  ;;  %v301_v1 = vsub.f32 %v89_v41, %v2959_v56  ;;  %v264_v3 = vand.u32 4294901760, %v263_v50  ;;  %v2974_v11 = vand.u32 4294901760, %v92_v58 }
  0x18   :  { %v273_v63 = vsub.f32 %v2943_v43, %v272_v54  ;;  %v283_v9 = vsub.f32 %v2949_v47, %v282_v59  ;;  %v292_v12 = vand.u32 4294901760, %v2964_v61 }
  0x19   :  { %2116 = vmatmul.mubr.f32.gmra.mrb[4].mxu1 %v214_v14  ;;  %v302_v14 = vand.u32 4294901760, %v301_v1  ;;  %v311_v17 = vsub.f32 %v92_v58, %v2974_v11 }
  0x1a   :  { %2145 = vmatmul.mubr.f32.gmra.mrb[6].mxu0 %v2874_v52  ;;  %2118 = vmatprep.mubr.f32.mxu1 %v224_v20  ;;  %v274_v18 = vand.u32 4294901760, %v273_v63  ;;  %v293_v20 = vsub.f32 %v2964_v61, %v292_v12  ;;  %v284_v24 = vand.u32 4294901760, %v283_v9 }
  0x1b   :  { %2147 = vmatprep.mubr.f32.mxu0 %v2878_v55  ;;  %v303_v38 = vsub.f32 %v301_v1, %v302_v14  ;;  %v312_v41 = vand.u32 4294901760, %v311_v17 }
  0x1c   :  { %v294_v42 = vand.u32 4294901760, %v293_v20 }
  0x1d   :  { %2119 = vmatmul.mubr.f32.gmra.mrb[6].mxu1 %v234_v45  ;;  %v313_v45 = vsub.f32 %v311_v17, %v312_v41  ;;  %v304_v46 = vand.u32 4294901760, %v303_v38 }
  0x1e   :  { %2148 = vmatmul.mubr.f32.gmra.mrb[8].mxu0 %v2902_v5  ;;  %2121 = vmatprep.mubr.f32.mxu1 %v244_v49 }
  0x1f   :  { %2150 = vmatprep.mubr.f32.mxu0 %v2906_v7  ;;  %v314_v49 = vand.u32 4294901760, %v313_v45 }
  0x21   :  { %2122 = vmatmul.mubr.f32.gmra.mrb[8].mxu1 %v254_v62 }
  0x22   :  { %2151 = vmatmul.mubr.f32.gmra.mrb[10].mxu0 %v2930_v25  ;;  %2124 = vmatprep.mubr.f32.mxu1 %v264_v3 }
  0x23   :  { %2153 = vmatprep.mubr.f32.mxu0 %v2934_v30 }
  0x25   :  { %2125 = vmatmul.mubr.f32.gmra.mrb[10].mxu1 %v274_v18 }
  0x26   :  { %2154 = vmatmul.mubr.f32.gmra.mrb[12].mxu0 %v2955_v51  ;;  %2127 = vmatprep.mubr.f32.mxu1 %v284_v24 }
  0x27   :  { %2156 = vmatprep.mubr.f32.mxu0 %v2959_v56 }
  0x29   :  { %2128 = vmatmul.mubr.f32.gmra.mrb[12].mxu1 %v294_v42 }
  0x2a   :  { %2157 = vmatmul.mubr.f32.gmra.mrb[14].mxu0 %v2974_v11  ;;  %2130 = vmatprep.mubr.f32.mxu1 %v304_v46 }
  0x2b   :  { %2161 = vmatprep.mubr.f32.mxu0 %v2815_v26 }
  0x2d   :  { %2131 = vmatmul.mubr.f32.gmra.mrb[14].mxu1 %v314_v49 }
  0x2e   :  { %2162 = vmatmul.mubr.f32.vlgmr.msra.gmra.mrb[0].mxu0 %v2804_v21 }
  0x2f   :  { %2186 = vmatpush3.msra.mxu0 %v2765_v2  ;;  %2164 = vmatprep.mubr.f32.mxu0 %v2822_v28 }
  0x30   :  { %2211 = vmatprep.subr.mxu0 %v2780_v8 }
  0x32   :  { %2165 = vmatmul.mubr.f32.gmra.mrb[2].mxu0 %v2825_v29 }
  0x33   :  { %2167 = vmatprep.mubr.f32.mxu0 %v2831_v31 }
  0x36   :  { %2168 = vmatmul.mubr.f32.gmra.mrb[4].mxu0 %v2856_v44 }
  0x37   :  { %2170 = vmatprep.mubr.f32.mxu0 %v2868_v48 }
  0x3a   :  { %2171 = vmatmul.mubr.f32.gmra.mrb[6].mxu0 %v2887_v60 }
  0x3b   :  { %2173 = vmatprep.mubr.f32.mxu0 %v2896_v0 }
  0x3e   :  { %2174 = vmatmul.mubr.f32.gmra.mrb[8].mxu0 %v2915_v13 }
  0x3f   :  { %2176 = vmatprep.mubr.f32.mxu0 %v2924_v19 }
  0x42   :  { %2177 = vmatmul.mubr.f32.gmra.mrb[10].mxu0 %v2943_v43 }
  0x43   :  { %2179 = vmatprep.mubr.f32.mxu0 %v2949_v47 }
  0x46   :  { %2180 = vmatmul.mubr.f32.gmra.mrb[12].mxu0 %v2964_v61 }
  0x47   :  { %2182 = vmatprep.mubr.f32.mxu0 %v301_v1 }
  0x4a   :  { %2183 = vmatmul.mubr.f32.gmra.mrb[14].mxu0 %v311_v17 }
  0x4b   :  { %2187 = vmatprep.mubr.f32.mxu0 %v162_v32 }
  0x4e   :  { %2188 = vmatmul.mubr.f32.vlgmr.msra.gmra.mrb[0].mxu0 %v172_v33 }
  0x4f   :  { %2212 = vmatpush3.msra.mxu0 %v2780_v8  ;;  %2190 = vmatprep.mubr.f32.mxu0 %v182_v36 }
  0x50   :  { %2237 = vmatprep.subr.mxu0 %v2765_v2 }
  0x52   :  { %2191 = vmatmul.mubr.f32.gmra.mrb[2].mxu0 %v192_v37  ;;  %v3402_v37 = vmov 0.0  }
  0x53   :  { %2193 = vmatprep.mubr.f32.mxu0 %v202_v39  ;;  %2365 = vmatprep.mubr.msk.f32.mxu1 %vm2727_vm1, %v3402_v37  ;;  %v1902_v39 = vld [vmem:[%s3398_s2] ss:$0 sm:$0xff] }
  0x56   :  { %2194 = vmatmul.mubr.f32.gmra.mrb[4].mxu0 %v212_v53 }
  0x57   :  { %2196 = vmatprep.mubr.f32.mxu0 %v222_v57 }
  0x5a   :  { %2197 = vmatmul.mubr.f32.gmra.mrb[6].mxu0 %v232_v6 }
  0x5b   :  { %2199 = vmatprep.mubr.f32.mxu0 %v242_v10 }
  0x5e   :  { %2200 = vmatmul.mubr.f32.gmra.mrb[8].mxu0 %v252_v27 }
  0x5f   :  { %2202 = vmatprep.mubr.f32.mxu0 %v262_v40 }
  0x62   :  { %2203 = vmatmul.mubr.f32.gmra.mrb[10].mxu0 %v272_v54 }
  0x63   :  { %2205 = vmatprep.mubr.f32.mxu0 %v282_v59 }
  0x66   :  { %2206 = vmatmul.mubr.f32.gmra.mrb[12].mxu0 %v292_v12 }
  0x67   :  { %2208 = vmatprep.mubr.f32.mxu0 %v302_v14 }
  0x6a   :  { %2209 = vmatmul.mubr.f32.gmra.mrb[14].mxu0 %v312_v41 }
  0x6b   :  { %2213 = vmatprep.mubr.f32.mxu0 %v2768_v4 }
  0x6e   :  { %2214 = vmatmul.mubr.f32.vlgmr.msra.gmra.mrb[0].mxu0 %v2791_v15 }
  0x6f   :  { %2238 = vmatpush3.msra.mxu0 %v2765_v2  ;;  %2216 = vmatprep.mubr.f32.mxu0 %v2793_v16 }
  0x72   :  { %2217 = vmatmul.mubr.f32.gmra.mrb[2].mxu0 %v2807_v22 }
  0x73   :  { %2219 = vmatprep.mubr.f32.mxu0 %v2810_v23 }
  0x76   :  { %2220 = vmatmul.mubr.f32.gmra.mrb[4].mxu0 %v2836_v34 }
  0x77   :  { %2222 = vmatprep.mubr.f32.mxu0 %v2838_v35 }
  0x7a   :  { %2223 = vmatmul.mubr.f32.gmra.mrb[6].mxu0 %v2874_v52 }
  0x7b   :  { %2225 = vmatprep.mubr.f32.mxu0 %v2878_v55 }
  0x7e   :  { %2226 = vmatmul.mubr.f32.gmra.mrb[8].mxu0 %v2902_v5 }
  0x7f   :  { %2228 = vmatprep.mubr.f32.mxu0 %v2906_v7 }
  0x82   :  { %2229 = vmatmul.mubr.f32.gmra.mrb[10].mxu0 %v2930_v25 }
  0x83   :  { %2231 = vmatprep.mubr.f32.mxu0 %v2934_v30 }
  0x86   :  { %2232 = vmatmul.mubr.f32.gmra.mrb[12].mxu0 %v2955_v51 }
  0x87   :  { %2234 = vmatprep.mubr.f32.mxu0 %v2959_v56 }
  0x8a   :  { %2235 = vmatmul.mubr.f32.gmra.mrb[14].mxu0 %v2974_v11 }
  0x8b   :  { %2239 = vmatprep.mubr.f32.mxu0 %v2768_v4  ;;  %v3406_v4 = vmov 0.0|0.0  }
  0x8c   :  { %2473 = vmatprep.subr.bf16.mxu0 %v3406_v4  ;;  %2521 = vmatprep.subr.bf16.mxu1 %v3406_v4 }
  0x8e   :  { %2240 = vmatmul.mubr.f32.vlgmr.msra.gmra.mrb[0].mxu0 %v2791_v15 }
  0x8f   :  { %2242 = vmatprep.mubr.f32.mxu0 %v2793_v16 }
  0x92   :  { %2243 = vmatmul.mubr.f32.gmra.mrb[2].mxu0 %v2807_v22 }
  0x93   :  { %2245 = vmatprep.mubr.f32.mxu0 %v2810_v23 }
  0x96   :  { %2246 = vmatmul.mubr.f32.gmra.mrb[4].mxu0 %v2836_v34 }
  0x97   :  { %2248 = vmatprep.mubr.f32.mxu0 %v2838_v35 }
  0x9a   :  { %2249 = vmatmul.mubr.f32.gmra.mrb[6].mxu0 %v2874_v52 }
  0x9b   :  { %2251 = vmatprep.mubr.f32.mxu0 %v2878_v55 }
  0x9e   :  { %2252 = vmatmul.mubr.f32.gmra.mrb[8].mxu0 %v2902_v5 }
  0x9f   :  { %2254 = vmatprep.mubr.f32.mxu0 %v2906_v7 }
  0xa2   :  { %2255 = vmatmul.mubr.f32.gmra.mrb[10].mxu0 %v2930_v25 }
  0xa3   :  { %2257 = vmatprep.mubr.f32.mxu0 %v2934_v30 }
  0xa6   :  { %2258 = vmatmul.mubr.f32.gmra.mrb[12].mxu0 %v2955_v51 }
  0xa7   :  { %2260 = vmatprep.mubr.f32.mxu0 %v2959_v56 }
  0xaa   :  { %2261 = vmatmul.mubr.f32.gmra.mrb[14].mxu0 %v2974_v11 }
  0xab   :  { %2295 = vmatprep.mubr.msk.f32.mxu0 %vm2727_vm1, %v3402_v37 }
  0xe4   :  { %v2111_v2 = vpop.f32.mrb[0].mxu1 }
  0xe5   :  { %v166_v8 = vpop.f32.mrb[1].mxu1  ;;  %v177_v44 = vadd.f32 %v2111_v2, %v1902_v39 }
  0xe6   :  { %v167_v48 = vadd.f32 %v1902_v39, %v166_v8 }
  0xe8   :  { %v2114_v15 = vpop.f32.mrb[2].mxu1 }
  0xe9   :  { %v186_v16 = vpop.f32.mrb[3].mxu1  ;;  %v197_v57 = vadd.f32 %v2114_v15, %v1902_v39 }
  0xea   :  { %v187_v0 = vadd.f32 %v1902_v39, %v186_v16 }
  0xec   :  { %v2117_v21 = vpop.f32.mrb[4].mxu1 }
  0xed   :  { %v206_v22 = vpop.f32.mrb[5].mxu1  ;;  %v217_v6 = vadd.f32 %v2117_v21, %v1902_v39 }
  0xee   :  { %v207_v13 = vadd.f32 %v1902_v39, %v206_v22 }
  0xf0   :  { %v2120_v23 = vpop.f32.mrb[6].mxu1 }
  0xf1   :  { %v226_v26 = vpop.f32.mrb[7].mxu1  ;;  %v237_v19 = vadd.f32 %v2120_v23, %v1902_v39 }
  0xf2   :  { %v227_v25 = vadd.f32 %v1902_v39, %v226_v26 }
  0xf4   :  { %v2123_v28 = vpop.f32.mrb[8].mxu1 }
  0xf5   :  { %v246_v29 = vpop.f32.mrb[9].mxu1  ;;  %v3068_v43 = vadd.f32 %v2123_v28, %v1902_v39 }
  0xf6   :  { %v3070_v47 = vadd.f32 %v1902_v39, %v246_v29 }
  0xf8   :  { %v2126_v31 = vpop.f32.mrb[10].mxu1 }
  0xf9   :  { %v266_v32 = vpop.f32.mrb[11].mxu1  ;;  %v3073_v56 = vadd.f32 %v2126_v31, %v1902_v39 }
  0xfa   :  { %v3075_v61 = vadd.f32 %v1902_v39, %v266_v32 }
  0xfc   :  { %v2129_v33 = vpop.f32.mrb[12].mxu1 }
  0xfd   :  { %v286_v34 = vpop.f32.mrb[13].mxu1  ;;  %v3077_v62 = vadd.f32 %v2129_v33, %v1902_v39 }
  0xfe   :  { %v3081_v9 = vadd.f32 %v1902_v39, %v286_v34 }
 0x100   :  { %v2132_v35 = vpop.f32.mrb[14].mxu1 }
 0x101   :  { %v306_v36 = vpop.f32.mrb[15].mxu1  ;;  %v3083_v11 = vadd.f32 %v2132_v35, %v1902_v39 }
 0x102   :  { %v3104_v22 = vadd.f32 %v1902_v39, %v306_v36 }
 0x161   :  { %v2241_v52 = vpop.f32.mrb[0].mxu0 }
 0x162   :  { %v2618_v53 = vadd.f32 %v2241_v52, %v177_v44  ;;  %v1091_v55 = vpop.f32.mrb[1].mxu0 }
 0x163   :  { %v2620_v60 = vadd.f32 %v1091_v55, %v167_v48 }
 0x164   :  { %v1186_v5 = vmax.f32 %v2618_v53, 0.0 }
 0x165   :  { %v1185_v7 = vmax.f32 %v2620_v60, 0.0  ;;  %v2244_v10 = vpop.f32.mrb[2].mxu0 }
 0x166   :  { %v1212_v27 = vsel %vm1204_vm2, %v1186_v5, 0  ;;  %v2622_v30 = vadd.f32 %v2244_v10, %v197_v57  ;;  %v1103_v40 = vpop.f32.mrb[3].mxu0 }
 0x167   :  { %v1260_v50 = vand.u32 4294901760, %v1212_v27  ;;  %v1209_v51 = vsel %vm1204_vm2, %v1185_v7, 0  ;;  %v2624_v54 = vadd.f32 %v1103_v40, %v187_v0 }
 0x168   :  { %v1257_v58 = vand.u32 4294901760, %v1209_v51  ;;  %v1188_v59 = vmax.f32 %v2622_v30, 0.0 }
 0x169   :  { %v3079_v63 = vsub.f32 %v1212_v27, %v1260_v50  ;;  %v1187_v1 = vmax.f32 %v2624_v54, 0.0  ;;  %v2247_v3 = vpop.f32.mrb[4].mxu0 }
 0x16a   :  { %v3085_v12 = vpack.c.bf16 %v1260_v50, %v1257_v58  ;;  %v3087_v14 = vsub.f32 %v1209_v51, %v1257_v58  ;;  %v1218_v17 = vsel %vm1204_vm2, %v1188_v59, 0  ;;  %v2626_v18 = vadd.f32 %v2247_v3, %v217_v6  ;;  %v1115_v20 = vpop.f32.mrb[5].mxu0 }
 0x16b   :  { %v1357_v24 = vand.u32 4294901760, %v3079_v63  ;;  %v1266_v38 = vand.u32 4294901760, %v1218_v17  ;;  %v1215_v41 = vsel %vm1204_vm2, %v1187_v1, 0  ;;  %v2628_v42 = vadd.f32 %v1115_v20, %v207_v13 }
 0x16c   :  { %v1350_v45 = vand.u32 4294901760, %v3087_v14  ;;  %v1263_v46 = vand.u32 4294901760, %v1215_v41  ;;  %v1190_v49 = vmax.f32 %v2626_v18, 0.0  ;;  %2475 = vmatpush3.bf16.xpose.msra.mxu0 %v3085_v12  ;;  %v2522_v2 = vpack.c.bf16 %v3079_v63, %v3087_v14 }
 0x16d   :  { %v3099_v8 = vsub.f32 %v3079_v63, %v1357_v24  ;;  %v3101_v15 = vsub.f32 %v1218_v17, %v1266_v38  ;;  %v1189_v16 = vmax.f32 %v2628_v42, 0.0  ;;  %v2250_v21 = vpop.f32.mrb[6].mxu0  ;;  %2476 = vmatprep.subr.bf16.mxu0 %v3406_v4 }
 0x16e   :  { %v3109_v23 = vsub.f32 %v3087_v14, %v1350_v45  ;;  %v3111_v26 = vpack.c.bf16 %v1266_v38, %v1263_v46  ;;  %v3113_v28 = vsub.f32 %v1215_v41, %v1263_v46  ;;  %v1224_v29 = vsel %vm1204_vm2, %v1190_v49, 0  ;;  %v1127_v31 = vpop.f32.mrb[7].mxu0  ;;  %2523 = vmatpush3.bf16.xpose.msra.mxu1 %v2522_v2 }
 0x16f   :  { %v1359_v32 = vand.u32 4294901760, %v3099_v8  ;;  %v1371_v33 = vand.u32 4294901760, %v3101_v15  ;;  %v1272_v34 = vand.u32 4294901760, %v1224_v29  ;;  %v1221_v35 = vsel %vm1204_vm2, %v1189_v16, 0  ;;  %2524 = vmatprep.subr.bf16.mxu1 %v3406_v4 }
 0x170   :  { %v1352_v36 = vand.u32 4294901760, %v3109_v23  ;;  %v1364_v39 = vand.u32 4294901760, %v3113_v28  ;;  %v1269_v44 = vand.u32 4294901760, %v1221_v35  ;;  %v2630_v48 = vadd.f32 %v2250_v21, %v237_v19 }
 0x171   :  { %v3125_v52 = vsub.f32 %v3101_v15, %v1371_v33  ;;  %v3127_v53 = vsub.f32 %v1224_v29, %v1272_v34  ;;  %v2632_v55 = vadd.f32 %v1127_v31, %v227_v25  ;;  %v2253_v57 = vpop.f32.mrb[8].mxu0  ;;  %v2525_v60 = vpack.c.bf16 %v3101_v15, %v3113_v28 }
 0x172   :  { %v3134_v0 = vsub.f32 %v3113_v28, %v1364_v39  ;;  %v3136_v5 = vpack.c.bf16 %v1272_v34, %v1269_v44  ;;  %v3138_v6 = vsub.f32 %v1221_v35, %v1269_v44  ;;  %v1192_v7 = vmax.f32 %v2630_v48, 0.0  ;;  %v1139_v10 = vpop.f32.mrb[9].mxu0 }
 0x173   :  { %v1373_v13 = vand.u32 4294901760, %v3125_v52  ;;  %v1385_v19 = vand.u32 4294901760, %v3127_v53  ;;  %v1191_v25 = vmax.f32 %v2632_v55, 0.0  ;;  %v2634_v27 = vadd.f32 %v2253_v57, %v3068_v43 }
 0x174   :  { %v1366_v30 = vand.u32 4294901760, %v3134_v0  ;;  %v1378_v40 = vand.u32 4294901760, %v3138_v6  ;;  %v1230_v50 = vsel %vm1204_vm2, %v1192_v7, 0  ;;  %v2636_v51 = vadd.f32 %v1139_v10, %v3070_v47  ;;  %2478 = vmatpush3.bf16.xpose.msra.mxu0 %v3111_v26 }
 0x175   :  { %v3151_v54 = vsub.f32 %v3127_v53, %v1385_v19  ;;  %v1278_v58 = vand.u32 4294901760, %v1230_v50  ;;  %v1227_v59 = vsel %vm1204_vm2, %v1191_v25, 0  ;;  %v1194_v1 = vmax.f32 %v2634_v27, 0.0  ;;  %v2256_v43 = vpop.f32.mrb[10].mxu0  ;;  %2479 = vmatprep.subr.bf16.mxu0 %v3406_v4 }
 0x176   :  { %v3158_v3 = vsub.f32 %v3138_v6, %v1378_v40  ;;  %v1275_v47 = vand.u32 4294901760, %v1227_v59  ;;  %v1193_v17 = vmax.f32 %v2636_v51, 0.0  ;;  %v2638_v18 = vadd.f32 %v2256_v43, %v3073_v56  ;;  %v1151_v20 = vpop.f32.mrb[11].mxu0  ;;  %2526 = vmatpush3.bf16.xpose.msra.mxu1 %v2525_v60 }
 0x177   :  { %v1387_v38 = vand.u32 4294901760, %v3151_v54  ;;  %v3162_v41 = vsub.f32 %v1230_v50, %v1278_v58  ;;  %v1236_v42 = vsel %vm1204_vm2, %v1194_v1, 0  ;;  %v2640_v46 = vadd.f32 %v1151_v20, %v3075_v61  ;;  %2527 = vmatprep.subr.bf16.mxu1 %v3406_v4 }
 0x178   :  { %v1380_v49 = vand.u32 4294901760, %v3158_v3  ;;  %v3168_v2 = vpack.c.bf16 %v1278_v58, %v1275_v47  ;;  %v3170_v16 = vsub.f32 %v1227_v59, %v1275_v47  ;;  %v1284_v21 = vand.u32 4294901760, %v1236_v42 }
 0x179   :  { %v3408_v56 = vand.u32 4294901760, %v3162_v41  ;;  %v1233_v29 = vsel %vm1204_vm2, %v1193_v17, 0  ;;  %v1196_v31 = vmax.f32 %v2638_v18, 0.0  ;;  %v1195_v34 = vmax.f32 %v2640_v46, 0.0  ;;  %v2259_v35 = vpop.f32.mrb[12].mxu0 }
 0x17a   :  { %v3409_v44 = vand.u32 4294901760, %v3170_v16  ;;  %v3175_v48 = vsub.f32 %v1236_v42, %v1284_v21  ;;  %v1281_v61 = vand.u32 4294901760, %v1233_v29  ;;  %v2642_v55 = vadd.f32 %v2259_v35, %v3077_v62  ;;  %v1163_v57 = vpop.f32.mrb[13].mxu0 }
 0x17b   :  { %v3181_v60 = vsub.f32 %v3162_v41, %v3408_v56  ;;  %v1242_v7 = vsel %vm1204_vm2, %v1196_v31, 0  ;;  %v1239_v10 = vsel %vm1204_vm2, %v1195_v34, 0  ;;  %v2644_v25 = vadd.f32 %v1163_v57, %v3081_v9 }
 0x17c   :  { %v3189_v27 = vsub.f32 %v3170_v16, %v3409_v44  ;;  %v3404_v50 = vand.u32 4294901760, %v3175_v48  ;;  %v3192_v62 = vpack.c.bf16 %v1284_v21, %v1281_v61  ;;  %v3194_v51 = vsub.f32 %v1233_v29, %v1281_v61  ;;  %2481 = vmatpush3.bf16.xpose.msra.mxu0 %v3136_v5 }
 0x17d   :  { %v1401_v58 = vand.u32 4294901760, %v3181_v60  ;;  %v1290_v59 = vand.u32 4294901760, %v1242_v7  ;;  %v1287_v1 = vand.u32 4294901760, %v1239_v10  ;;  %v1198_v43 = vmax.f32 %v2642_v55, 0.0  ;;  %v2262_v47 = vpop.f32.mrb[14].mxu0  ;;  %2482 = vmatprep.subr.bf16.mxu0 %v3406_v4 }
 0x17e   :  { %v1394_v9 = vand.u32 4294901760, %v3189_v27  ;;  %v1414_v17 = vsub.f32 %v3175_v48, %v3404_v50  ;;  %v3405_v18 = vand.u32 4294901760, %v3194_v51  ;;  %v1197_v20 = vmax.f32 %v2644_v25, 0.0  ;;  %v1175_v42 = vpop.f32.mrb[15].mxu0 }
 0x17f   :  { %v3204_v46 = vsub.f32 %v1242_v7, %v1290_v59  ;;  %v3206_v21 = vpack.c.bf16 %v1290_v59, %v1287_v1  ;;  %v3208_v29 = vsub.f32 %v1239_v10, %v1287_v1  ;;  %v1248_v31 = vsel %vm1204_vm2, %v1198_v43, 0 }
 0x180   :  { %v1415_v34 = vand.u32 4294901760, %v1414_v17  ;;  %v1407_v35 = vsub.f32 %v3194_v51, %v3405_v18  ;;  %v1296_v61 = vand.u32 4294901760, %v1248_v31  ;;  %v1245_v55 = vsel %vm1204_vm2, %v1197_v20, 0 }
 0x181   :  { %v1427_v57 = vand.u32 4294901760, %v3204_v46  ;;  %v1420_v60 = vand.u32 4294901760, %v3208_v29  ;;  %v1293_v7 = vand.u32 4294901760, %v1245_v55  ;;  %v2646_v25 = vadd.f32 %v2262_v47, %v3083_v11 }
 0x182   :  { %v1408_v27 = vand.u32 4294901760, %v1407_v35  ;;  %v3218_v10 = vsub.f32 %v1248_v31, %v1296_v61  ;;  %v2648_v59 = vadd.f32 %v1175_v42, %v3104_v22  ;;  %v2528_v1 = vpack.c.bf16 %v3127_v53, %v3138_v6 }
 0x183   :  { %v1428_v43 = vsub.f32 %v3204_v46, %v1427_v57  ;;  %v1421_v17 = vsub.f32 %v3208_v29, %v1420_v60  ;;  %v3225_v20 = vpack.c.bf16 %v1296_v61, %v1293_v7  ;;  %v3227_v37 = vsub.f32 %v1245_v55, %v1293_v7 }
 0x184   :  { %v1441_v50 = vand.u32 4294901760, %v3218_v10  ;;  %v1200_v18 = vmax.f32 %v2646_v25, 0.0  ;;  %v1199_v11 = vmax.f32 %v2648_v59, 0.0  ;;  %2529 = vmatpush3.bf16.xpose.msra.mxu1 %v2528_v1  ;;  %2484 = vmatpush3.bf16.xpose.msra.mxu0 %v3168_v2  ;;  %v2531_v22 = vpack.c.bf16 %v3162_v41, %v3170_v16 }
 0x185   :  { %v1429_v47 = vand.u32 4294901760, %v1428_v43  ;;  %v1422_v42 = vand.u32 4294901760, %v1421_v17  ;;  %v1434_v31 = vand.u32 4294901760, %v3227_v37  ;;  %2530 = vmatprep.subr.bf16.mxu1 %v3406_v4  ;;  %2485 = vmatprep.subr.bf16.mxu0 %v3406_v4  ;;  %v2534_v35 = vpack.c.bf16 %v3175_v48, %v3194_v51 }
 0x186   :  { %v1442_v61 = vsub.f32 %v3218_v10, %v1441_v50  ;;  %v1254_v55 = vsel %vm1204_vm2, %v1200_v18, 0  ;;  %v1251_v7 = vsel %vm1204_vm2, %v1199_v11, 0  ;;  %v2537_v25 = vpack.c.bf16 %v3204_v46, %v3208_v29 }
 0x187   :  { %v1435_v59 = vsub.f32 %v3227_v37, %v1434_v31  ;;  %v1302_v1 = vand.u32 4294901760, %v1254_v55  ;;  %v1299_v43 = vand.u32 4294901760, %v1251_v7  ;;  %v2540_v17 = vpack.c.bf16 %v3218_v10, %v3227_v37 }
 0x188   :  { %v1443_v4 = vand.u32 4294901760, %v1442_v61  ;;  %v2498_v56 = vpack.c.bf16 %v1359_v32, %v1352_v36  ;;  %v2501_v18 = vpack.c.bf16 %v1373_v13, %v1366_v30  ;;  %v2504_v46 = vpack.c.bf16 %v1387_v38, %v1380_v49  ;;  %v1201_v38 = vld [vmem:[%s3399_s3] sm:$0x1] }
 0x189   :  { %v1436_v29 = vand.u32 4294901760, %v1435_v59  ;;  %v1454_v11 = vsub.f32 %v1254_v55, %v1302_v1  ;;  %v3258_v44 = vpack.c.bf16 %v1302_v1, %v1299_v43  ;;  %v1447_v37 = vsub.f32 %v1251_v7, %v1299_v43 }
 0x18a   :  { %v2507_v10 = vpack.c.bf16 %v1401_v58, %v1394_v9  ;;  %v3260_v23 = vpack.c.bf16 %v1415_v34, %v1408_v27  ;;  %v3262_v8 = vpack.c.bf16 %v1429_v47, %v1422_v42  ;;  %v3268_v32 = vpack.c.bf16 %v1357_v24, %v1350_v45 }
 0x18b   :  { %v1455_v36 = vand.u32 4294901760, %v1454_v11  ;;  %v1448_v52 = vand.u32 4294901760, %v1447_v37  ;;  %v2543_v0 = vpack.c.bf16 %v1454_v11, %v1447_v37  ;;  %v3270_v13 = vpack.c.bf16 %v1443_v4, %v1436_v29 }
 0x18c   :  { %2532 = vmatpush3.bf16.xpose.msra.mxu1 %v2531_v22  ;;  %2487 = vmatpush3.bf16.xpose.msra.mxu0 %v3192_v62  ;;  %v3277_v30 = vpack.c.bf16 %v1371_v33, %v1364_v39  ;;  %v3283_v63 = vpack.c.bf16 %v1385_v19, %v1378_v40  ;;  %v3410_v14 = vand.u32 4294901760, %v3170_v16  ;;  %v3411_v4 = vand.u32 4294901760, %v3162_v41 }
 0x18d   :  { %v1456_v45 = vsub.f32 %v1454_v11, %v1455_v36  ;;  %v1449_v54 = vsub.f32 %v1447_v37, %v1448_v52  ;;  %v3412_v3 = vmov 0.0|0.0   ;;  %v3413_v15 = vand.u32 4294901760, %v3194_v51 }
 0x18e   :  { %v3289_v24 = vpack.c.bf16 %v3411_v4, %v3410_v14  ;;  %2533 = vmatprep.subr.bf16.mxu1 %v3412_v3  ;;  %2488 = vmatprep.subr.bf16.mxu0 %v3412_v3  ;;  %v3414_v28 = vand.u32 4294901760, %v3175_v48  ;;  %v3299_v39 = vpack.c.bf16 %v1427_v57, %v1420_v60  ;;  %v3301_v53 = vpack.c.bf16 %v1441_v50, %v1434_v31 }
 0x18f   :  { %v3303_v6 = vpack.c.bf16 %v1455_v36, %v1448_v52  ;;  %v1457_v19 = vand.u32 4294901760, %v1456_v45  ;;  %v1450_v40 = vand.u32 4294901760, %v1449_v54  ;;  %v1206_v49 = vsel %vm1204_vm2, %v1201_v38, 0 }
 0x190   :  { %v3297_v33 = vpack.c.bf16 %v3414_v28, %v3413_v15  ;;  %v3312_v16 = vand.u32 4294901760, %v1206_v49  ;;  %v3415_v9 = vmov 0.0  }
 0x191   :  { %v2519_v41 = vpack.c.bf16 %v1457_v19, %v1450_v40 }
 0x192   :  { %v1338_v48 = vsub.f32 %v1206_v49, %v3312_v16 }
 0x194   :  { %2535 = vmatpush3.bf16.xpose.msra.mxu1 %v2534_v35  ;;  %2490 = vmatpush3.bf16.xpose.msra.mxu0 %v3206_v21  ;;  %v1339_v50 = vand.u32 4294901760, %v1338_v48 }
 0x195   :  { %2536 = vmatprep.subr.bf16.mxu1 %v3412_v3  ;;  %2491 = vmatprep.subr.bf16.mxu0 %v3412_v3 }
 0x196   :  { %v1340_v51 = vsub.f32 %v1338_v48, %v1339_v50 }
 0x198   :  { %v1341_v58 = vand.u32 4294901760, %v1340_v51 }
 0x19c   :  { %2538 = vmatpush3.bf16.xpose.msra.mxu1 %v2537_v25  ;;  %2493 = vmatpush3.bf16.xpose.msra.mxu0 %v3225_v20 }
 0x19d   :  { %2539 = vmatprep.subr.bf16.mxu1 %v3412_v3  ;;  %2494 = vmatprep.subr.bf16.mxu0 %v3412_v3 }
 0x1a4   :  { %2541 = vmatpush3.bf16.xpose.msra.mxu1 %v2540_v17  ;;  %2496 = vmatpush3.bf16.xpose.msra.mxu0 %v3258_v44 }
 0x1a5   :  { %2542 = vmatprep.subr.bf16.mxu1 %v3412_v3  ;;  %2497 = vmatprep.subr.bf16.mxu0 %v3412_v3 }
 0x1ab   :  { %2296 = vmatmul.mubr.f32.vlgmr.msra.gmra.mrb[16].mxu0 %v1341_v58 }
 0x1ac   :  { %2544 = vmatpush3.bf16.xpose.msra.mxu1 %v2543_v0  ;;  %2499 = vmatpush3.bf16.xpose.msra.mxu0 %v2498_v56 }
 0x1ad   :  { %2545 = vmatprep.subr.bf16.mxu1 %v3412_v3  ;;  %2500 = vmatprep.subr.bf16.mxu0 %v3412_v3 }
 0x1ae   :  { %2330 = vmatprep.mubr.msk.f32.mxu0 %vm2727_vm1, %v3415_v9 }
 0x1b3   :  { %2366 = vmatmul.mubr.f32.vlgmr.msra.gmra.mrb[16].mxu1 %v1338_v48 }
 0x1b4   :  { %2547 = vmatpush3.bf16.xpose.msra.mxu1 %v3085_v12  ;;  %2502 = vmatpush3.bf16.xpose.msra.mxu0 %v2501_v18 }
 0x1b5   :  { %2548 = vmatprep.subr.bf16.mxu1 %v3412_v3  ;;  %2503 = vmatprep.subr.bf16.mxu0 %v3412_v3 }
 0x1b6   :  { %2400 = vmatprep.mubr.msk.f32.mxu1 %vm2727_vm1, %v3415_v9 }
 0x1bc   :  { %2550 = vmatpush3.bf16.xpose.msra.mxu1 %v3111_v26  ;;  %2505 = vmatpush3.bf16.xpose.msra.mxu0 %v2504_v46 }
 0x1bd   :  { %2551 = vmatprep.subr.bf16.mxu1 %v3412_v3  ;;  %2506 = vmatprep.subr.bf16.mxu0 %v3412_v3 }
 0x1c4   :  { %2553 = vmatpush3.bf16.xpose.msra.mxu1 %v3136_v5  ;;  %2508 = vmatpush3.bf16.xpose.msra.mxu0 %v2507_v10 }
 0x1c5   :  { %2554 = vmatprep.subr.bf16.mxu1 %v3412_v3  ;;  %2509 = vmatprep.subr.bf16.mxu0 %v3412_v3 }
 0x1cc   :  { %2556 = vmatpush3.bf16.xpose.msra.mxu1 %v3168_v2  ;;  %2511 = vmatpush3.bf16.xpose.msra.mxu0 %v3260_v23 }
 0x1cd   :  { %2557 = vmatprep.subr.bf16.mxu1 %v3412_v3  ;;  %2512 = vmatprep.subr.bf16.mxu0 %v3412_v3 }
 0x1d4   :  { %2559 = vmatpush3.bf16.xpose.msra.mxu1 %v3192_v62  ;;  %2514 = vmatpush3.bf16.xpose.msra.mxu0 %v3262_v8 }
 0x1d5   :  { %2560 = vmatprep.subr.bf16.mxu1 %v3412_v3  ;;  %2515 = vmatprep.subr.bf16.mxu0 %v3412_v3 }
 0x1dc   :  { %2562 = vmatpush3.bf16.xpose.msra.mxu1 %v3206_v21  ;;  %2517 = vmatpush3.bf16.xpose.msra.mxu0 %v3270_v13 }
 0x1dd   :  { %2563 = vmatprep.subr.bf16.mxu1 %v3412_v3  ;;  %2518 = vmatprep.subr.bf16.mxu0 %v3412_v3 }
 0x1e4   :  { %2565 = vmatpush3.bf16.xpose.msra.mxu1 %v3225_v20  ;;  %2520 = vmatpush3.bf16.xpose.msra.mxu0 %v2519_v41 }
 0x1e5   :  { %2566 = vmatprep.subr.bf16.mxu1 %v3412_v3 }
 0x1eb   :  { %2331 = vmatmul.mubr.f32.vlgmr.msra.gmra.mrb[16].mxu0 %v3312_v16 }
 0x1ec   :  { %2568 = vmatpush3.bf16.xpose.msra.mxu1 %v3258_v44 }
 0x1ed   :  { %2569 = vmatprep.subr.bf16.mxu1 %v3412_v3 }
 0x1f3   :  { %2401 = vmatmul.mubr.f32.vlgmr.msra.gmra.mrb[16].mxu1 %v1339_v50 }
 0x1f4   :  { %2571 = vmatpush3.bf16.xpose.msra.mxu1 %v3268_v32  ;;  %2435 = vmatprep.mubr.msk.f32.mxu1 %vm2727_vm1, %v3415_v9 }
 0x1f5   :  { %2572 = vmatprep.subr.bf16.mxu1 %v3412_v3 }
 0x1fc   :  { %2574 = vmatpush3.bf16.xpose.msra.mxu1 %v3277_v30 }
 0x1fd   :  { %2575 = vmatprep.subr.bf16.mxu1 %v3412_v3 }
 0x204   :  { %2577 = vmatpush3.bf16.xpose.msra.mxu1 %v3283_v63 }
 0x205   :  { %2578 = vmatprep.subr.bf16.mxu1 %v3412_v3 }
 0x20c   :  { %2580 = vmatpush3.bf16.xpose.msra.mxu1 %v3289_v24 }
 0x20d   :  { %2581 = vmatprep.subr.bf16.mxu1 %v3412_v3 }
 0x214   :  { %2583 = vmatpush3.bf16.xpose.msra.mxu1 %v3297_v33 }
 0x215   :  { %2584 = vmatprep.subr.bf16.mxu1 %v3412_v3 }
 0x21c   :  { %2586 = vmatpush3.bf16.xpose.msra.mxu1 %v3299_v39 }
 0x21d   :  { %2587 = vmatprep.subr.bf16.mxu1 %v3412_v3 }
 0x224   :  { %2589 = vmatpush3.bf16.xpose.msra.mxu1 %v3301_v53 }
 0x225   :  { %2590 = vmatprep.subr.bf16.mxu1 %v3412_v3 }
 0x22c   :  { %2592 = vmatpush3.bf16.xpose.msra.mxu1 %v3303_v6 }
 0x22d   :  { %2593 = vmatprep.subr.bf16.mxu1 %v3412_v3 }
 0x233   :  { %2436 = vmatmul.mubr.f32.vlgmr.msra.gmra.mrb[16].mxu1 %v3312_v16 }
 0x234   :  { %2595 = vmatpush3.bf16.xpose.msra.mxu1 %v3085_v12  ;;  %2470 = vmatprep.mubr.msk.f32.mxu1 %vm2727_vm1, %v3415_v9 }
 0x235   :  { %2596 = vmatprep.subr.bf16.mxu1 %v3412_v3 }
 0x23c   :  { %2598 = vmatpush3.bf16.xpose.msra.mxu1 %v3111_v26 }
 0x23d   :  { %2599 = vmatprep.subr.bf16.mxu1 %v3412_v3 }
 0x244   :  { %2601 = vmatpush3.bf16.xpose.msra.mxu1 %v3136_v5  ;;  %v1203_v5 = vstv %s3400_s4 }
 0x245   :  { %2602 = vmatprep.subr.bf16.mxu1 %v3412_v3 }
 0x24c   :  { %2604 = vmatpush3.bf16.xpose.msra.mxu1 %v3168_v2 }
 0x24d   :  { %2605 = vmatprep.subr.bf16.mxu1 %v3412_v3 }
 0x254   :  { %2607 = vmatpush3.bf16.xpose.msra.mxu1 %v3192_v62 }
 0x255   :  { %2608 = vmatprep.subr.bf16.mxu1 %v3412_v3 }
 0x25c   :  { %2610 = vmatpush3.bf16.xpose.msra.mxu1 %v3206_v21 }
 0x25d   :  { %2611 = vmatprep.subr.bf16.mxu1 %v3412_v3 }
 0x264   :  { %2613 = vmatpush3.bf16.xpose.msra.mxu1 %v3225_v20 }
 0x265   :  { %2614 = vmatprep.subr.bf16.mxu1 %v3412_v3 }
 0x26c   :  { %2616 = vmatpush3.bf16.xpose.msra.mxu1 %v3258_v44 }
 0x273   :  { %2471 = vmatmul.mubr.f32.vlgmr.msra.gmra.mrb[16].mxu1 %v3312_v16 }
 0x2be   :  { %v1494_v12 = vpop.f32.mrb[16].mxu0 }
 0x2bf   :  { %v2332_v26 = vpop.f32.mrb[17].mxu0  ;;  %v2649_v2 = vadd.f32 %v1494_v12, %v1203_v5 }
 0x346   :  { %v1893_v56 = vpop.f32.mrb[16].mxu1 }
 0x347   :  { %v2650_v62 = vadd.f32 %v2649_v2, %v1893_v56  ;;  %v2472_v21 = vpop.f32.mrb[17].mxu1 }
 0x349   :  { %1897 = vst [vmem:[%s3401_s5] sm:$0x1] %v2650_v62 }

</bundles_post_ra>
